<compile_context>
chip_gen: v6e
topology: v6e:2x2x1
jax: 0.10.0
libtpu: 0.0.40
codegen_flags: <defaults>
</compile_context>

<pallas_src>
import functools

import jax
import jax.numpy as jnp
from jax.experimental import pallas as pl
from jax.experimental.pallas import tpu as pltpu


def _zca_eval_kernel(sub_ref, bias_ref, x_ref, o_ref):
    # sub_ref : (R, R)  fused whitening matrix (block-diagonal or per-group)
    # bias_ref: (R, 1)  fused bias (mean + affine bias folded in)
    # x_ref   : (R, T)  one spatial tile of one sample (and group, if grouped)
    # o_ref   : (R, T)  matching output tile
    x = x_ref[...].astype(jnp.float32)
    y = jnp.dot(sub_ref[...], x, preferred_element_type=jnp.float32)
    o_ref[...] = (y + bias_ref[...]).astype(o_ref.dtype)


def _vmem_budget_bytes():
    """Generation-aware scoped-VMEM budget (~70% of physical capacity)."""
    try:
        cap = int(pltpu.get_tpu_info().vmem_capacity_bytes)
    except Exception:
        cap = 64 * 1024 * 1024  # conservative fallback: v7x per-TC VMEM
    return int(0.70 * cap)      # ~44 MiB on v7x, ~90 MiB on v5e / v6e


def _pick_spatial_tile(hw, rows, itemsize, data_budget_bytes):
    """Largest lane-dense T such that 4 live (rows, T) buffers fit the budget.

    4 = double-buffered x block + double-buffered out block.
    """
    max_cols = data_budget_bytes // (4 * rows * itemsize)
    max_cols = max(128, (max_cols // 128) * 128)
    if hw <= max_cols:
        # Full extent is always a legal block dim.  NOTE: hw < 128 means every
        # store is a masked vst.msk; pad the spatial dim upstream for large
        # workloads with tiny feature maps (e.g. 7x7).
        return hw
    # Prefer an exact divisor (unmasked stores) but never drop below 512
    # columns: measured tiling data shows <512-col tiles fall well off the
    # HBM roofline (worst on v5e's 0.82 TB/s path).
    t = max_cols
    while t >= 512:
        if hw % t == 0:
            return t
        t -= 128
    return max_cols  # ragged last tile (Pallas masks the store)


def _cap_for_two_way_parallelism(t, hw, other_parallel_extent):
    # v7x has 2 TensorCores per chip: make sure the all-"parallel" grid has at
    # least 2 steps so megacore sharding can use both.  No-op on v5e/v6e.
    if other_parallel_extent > 1 or hw < 256:
        return t
    return min(t, max(128, ((hw // 2) // 128) * 128))


def zca_norm_pi_eval(x, running_mean, running_subspaces, weight, bias, groups):
    """Inference forward of ZCANormPI.

    x:                  (N, C, H, W)  float32 or bfloat16
    running_mean:       (C, 1)
    running_subspaces:  (G, L, L) with L = C // G
    weight, bias:       (C, 1)
    """
    N, C, H, W = x.shape
    G = groups
    assert C % G == 0, "num_features must be divisible by groups"
    L = C // G
    HW = H * W
    itemsize = jnp.dtype(x.dtype).itemsize
    sublane = {4: 8, 2: 16, 1: 32}.get(itemsize, 8)  # dtype-aware sublane tile

    # Free reshape: trailing dims of NCHW are contiguous.
    x3d = x.reshape(N, C, HW)

    # Fold mean / weight / bias into the per-group whitening matrix.
    #   y = w*(S@(x-m)) + b  ==  (diag(w)@S)@x + (b - (diag(w)@S)@m)
    w_g = weight.reshape(G, L, 1).astype(jnp.float32)
    b_g = bias.reshape(G, L, 1).astype(jnp.float32)
    m_g = running_mean.reshape(G, L, 1).astype(jnp.float32)
    sub_g = w_g * running_subspaces.astype(jnp.float32)          # (G, L, L)
    bias_g = b_g - jnp.matmul(sub_g, m_g)                        # (G, L, 1)

    budget = _vmem_budget_bytes()
    headroom = 8 << 20  # compiler internal scratch / pipeline slack

    # Small groups -> block-diagonal merge (also the fallback whenever L does
    # not match the dtype's sublane tile).  Cap param size at C<=1024 (4 MiB).
    use_blockdiag = (L <= 64 or L % sublane != 0) and C <= 1024

    if use_blockdiag:
        gi = jnp.arange(G)
        bd = jnp.zeros((G, L, G, L), dtype=jnp.float32)
        bd = bd.at[gi, :, gi, :].set(sub_g)                      # block diag
        sub_full = bd.reshape(C, C)
        bias_full = bias_g.reshape(C, 1)

        rows = C
        param_bytes = 2 * (C * C + C) * 4
        data_budget = max(1 << 20, budget - param_bytes - headroom)
        T = _pick_spatial_tile(HW, rows, itemsize, data_budget)
        T = _cap_for_two_way_parallelism(T, HW, N)
        n_t = pl.cdiv(HW, T)
        vmem_needed = param_bytes + 4 * rows * T * itemsize
        vmem_limit = int(min(budget, max(32 << 20, vmem_needed + headroom)))

        x_spec_kwargs = {}
        if n_t >= 8:  # many tiny steps -> deepen pipeline to hide DMA issue
            x_spec_kwargs["pipeline_mode"] = pl.Buffered(3)

        cost = pl.CostEstimate(
            flops=2 * N * C * C * HW,
            transcendentals=0,
            bytes_accessed=2 * N * C * HW * itemsize + (C * C + C) * 4,
        )

        out3d = pl.pallas_call(
            _zca_eval_kernel,
            out_shape=jax.ShapeDtypeStruct((N, C, HW), x.dtype),
            grid_spec=pltpu.PrefetchScalarGridSpec(
                num_scalar_prefetch=0,
                grid=(N, n_t),
                in_specs=[
                    # Fused params: constant across the grid -> stay resident.
                    pl.BlockSpec((C, C), lambda n, t: (0, 0)),
                    pl.BlockSpec((C, 1), lambda n, t: (0, 0)),
                    # x block: one sample, all channels, one spatial tile.
                    pl.BlockSpec((None, C, T), lambda n, t: (n, 0, t),
                                 **x_spec_kwargs),
                ],
                out_specs=pl.BlockSpec((None, C, T), lambda n, t: (n, 0, t)),
            ),
            compiler_params=pltpu.CompilerParams(
                dimension_semantics=("parallel", "parallel"),
                vmem_limit_bytes=vmem_limit,
            ),
            cost_estimate=cost,
        )(sub_full, bias_full, x3d)
        return out3d.reshape(N, C, H, W)

    # Grouped path (large L).  Grid ordered (G, N, t) so per-group params stay
    # resident across the full N x t sweep (no re-fetch on every sample).
    assert L % sublane == 0, (
        "channels-per-group must be a multiple of the dtype sublane tile "
        f"({sublane} for itemsize {itemsize})")
    x4d = x3d.reshape(N, G, L, HW)  # free reshape

    rows = L
    param_bytes = 2 * (L * L + L) * 4
    data_budget = max(1 << 20, budget - param_bytes - headroom)
    T = _pick_spatial_tile(HW, rows, itemsize, data_budget)
    T = _cap_for_two_way_parallelism(T, HW, N * G)
    n_t = pl.cdiv(HW, T)
    vmem_needed = param_bytes + 4 * rows * T * itemsize
    vmem_limit = int(min(budget, max(32 << 20, vmem_needed + headroom)))

    x_spec_kwargs = {}
    if n_t >= 8:
        x_spec_kwargs["pipeline_mode"] = pl.Buffered(3)

    cost = pl.CostEstimate(
        flops=2 * N * C * L * HW,
        transcendentals=0,
        bytes_accessed=2 * N * C * HW * itemsize + G * (L * L + L) * 4,
    )

    out4d = pl.pallas_call(
        _zca_eval_kernel,
        out_shape=jax.ShapeDtypeStruct((N, G, L, HW), x.dtype),
        grid_spec=pltpu.PrefetchScalarGridSpec(
            num_scalar_prefetch=0,
            grid=(G, N, n_t),
            in_specs=[
                pl.BlockSpec((None, L, L), lambda g, n, t: (g, 0, 0)),
                pl.BlockSpec((None, L, 1), lambda g, n, t: (g, 0, 0)),
                pl.BlockSpec((None, None, L, T),
                             lambda g, n, t: (n, g, 0, t), **x_spec_kwargs),
            ],
            out_specs=pl.BlockSpec((None, None, L, T),
                                   lambda g, n, t: (n, g, 0, t)),
        ),
        compiler_params=pltpu.CompilerParams(
            dimension_semantics=("parallel", "parallel", "parallel"),
            vmem_limit_bytes=vmem_limit,
        ),
        cost_estimate=cost,
    )(sub_g, bias_g, x4d)
    return out4d.reshape(N, C, H, W)


def _reference(x, running_mean, running_subspaces, weight, bias, groups):
    """Pure-JAX reference mirroring the PyTorch eval branch exactly."""
    N, C, H, W = x.shape
    L = C // groups
    x2d = jnp.transpose(x, (1, 0, 2, 3)).reshape(C, -1)
    x2d = x2d - running_mean
    chunks = [running_subspaces[i] @ x2d[i * L:(i + 1) * L]
              for i in range(groups)]
    y = jnp.concatenate(chunks, axis=0)
    y = y * weight + bias
    return jnp.transpose(y.reshape(C, N, H, W), (1, 0, 2, 3))


if __name__ == "__main__":
    # Module config (matches ZCANormPI(num_features=32, groups=4)).
    num_features = 32                 # C
    groups = 4                        # G
    length = num_features // groups   # L = 8

    N, H, W = 2, 16, 16               # HW = 256 (multiple of 128)

    key = jax.random.PRNGKey(0)
    kx, kw, kb, km, ks = jax.random.split(key, 5)

    x = jax.random.normal(kx, (N, num_features, H, W), dtype=jnp.float32)
    # weight ~ U[0,1) as in reset_parameters(); buffers randomized (as they
    # would be after training) so the whitening matmul + folding is exercised.
    weight = jax.random.uniform(kw, (num_features, 1), dtype=jnp.float32)
    bias = 0.1 * jax.random.normal(kb, (num_features, 1), dtype=jnp.float32)
    running_mean = 0.1 * jax.random.normal(km, (num_features, 1),
                                           dtype=jnp.float32)
    running_subspaces = (
        jnp.broadcast_to(jnp.eye(length, dtype=jnp.float32),
                         (groups, length, length))
        + 0.05 * jax.random.normal(ks, (groups, length, length),
                                   dtype=jnp.float32)
    )

    fwd = jax.jit(functools.partial(zca_norm_pi_eval, groups=groups))
    out = fwd(x, running_mean, running_subspaces, weight, bias)
    out = jax.block_until_ready(out)

    ref = _reference(x, running_mean, running_subspaces, weight, bias, groups)
    assert out.shape == (N, num_features, H, W)
    assert jnp.allclose(out, ref, atol=1e-4, rtol=1e-4), (
        float(jnp.max(jnp.abs(out - ref))))

    print("KERNEL_OK")
</pallas_src>

<mosaic_0001>
module attributes {stable_mosaic.version = 11 : i64} {
  func.func @_zca_eval_kernel(%arg0: i32, %arg1: i32, %arg2: memref<32x32xf32, #tpu.memory_space<vmem>>, %arg3: memref<32x1xf32, #tpu.memory_space<vmem>>, %arg4: memref<1x32x256xf32, #tpu.memory_space<vmem>>, %arg5: memref<1x32x256xf32, #tpu.memory_space<vmem>>) attributes {dimension_semantics = [#tpu.dimension_semantics<parallel>, #tpu.dimension_semantics<parallel>], iteration_bounds = array<i64: 2, 1>, scalar_prefetch = 0 : i64, scratch_operands = 0 : i64, tpu.core_type = #tpu.core_type<tc>, window_params = [{pipeline_mode = #tpu.pipeline_mode<synchronous>, transform_indices = @transform_0, window_bounds = array<i64: 32, 32>}, {pipeline_mode = #tpu.pipeline_mode<synchronous>, transform_indices = @transform_1, window_bounds = array<i64: 32, 1>}, {transform_indices = @transform_2, window_bounds = array<i64: 1, 32, 256>}, {transform_indices = @transform_3, window_bounds = array<i64: 1, 32, 256>}]} {
    %c0 = arith.constant 0 : index
    %c0_0 = arith.constant 0 : index
    %c0_1 = arith.constant 0 : index
    %0 = vector.load %arg4[%c0, %c0_0, %c0_1] : memref<1x32x256xf32, #tpu.memory_space<vmem>>, vector<1x32x256xf32>
    %1 = vector.shape_cast %0 : vector<1x32x256xf32> to vector<32x256xf32>
    %c0_2 = arith.constant 0 : index
    %c0_3 = arith.constant 0 : index
    %2 = vector.load %arg2[%c0_2, %c0_3] : memref<32x32xf32, #tpu.memory_space<vmem>>, vector<32x32xf32>
    %cst = arith.constant dense<0.000000e+00> : vector<32x256xf32>
    %3 = tpu.matmul %2, %1, %cst {dimension_numbers = #tpu.dot_dimension_numbers<[1], [0], [0], [1], [0, 0, 1, 1], [], []>} : vector<32x32xf32>, vector<32x256xf32>, vector<32x256xf32> -> vector<32x256xf32>
    %c0_4 = arith.constant 0 : index
    %c0_5 = arith.constant 0 : index
    %4 = vector.load %arg3[%c0_4, %c0_5] : memref<32x1xf32, #tpu.memory_space<vmem>>, vector<32x1xf32>
    %5 = vector.broadcast %4 : vector<32x1xf32> to vector<32x256xf32>
    %6 = arith.addf %3, %5 : vector<32x256xf32>
    %c0_6 = arith.constant 0 : index
    %c0_7 = arith.constant 0 : index
    %c0_8 = arith.constant 0 : index
    %7 = vector.load %arg5[%c0_6, %c0_7, %c0_8] : memref<1x32x256xf32, #tpu.memory_space<vmem>>, vector<1x32x256xf32>
    %8 = vector.shape_cast %7 : vector<1x32x256xf32> to vector<32x256xf32>
    %9 = vector.shape_cast %6 : vector<32x256xf32> to vector<1x32x256xf32>
    tpu.vector_store %arg5[%c0_6, %c0_7, %c0_8], %9 {strides = array<i32>} : memref<1x32x256xf32, #tpu.memory_space<vmem>>, vector<1x32x256xf32>,
    return
  }
  func.func @transform_0(%arg0: i32, %arg1: i32) -> (i32, i32) {
    %c0_i32 = arith.constant 0 : i32
    %c0_i32_0 = arith.constant 0 : i32
    %c0_i32_1 = arith.constant 0 : i32
    return %c0_i32, %c0_i32_0 : i32, i32
  }
  func.func @transform_1(%arg0: i32, %arg1: i32) -> (i32, i32) {
    %c0_i32 = arith.constant 0 : i32
    %c0_i32_0 = arith.constant 0 : i32
    %c0_i32_1 = arith.constant 0 : i32
    return %c0_i32, %c0_i32_0 : i32, i32
  }
  func.func @transform_2(%arg0: i32, %arg1: i32) -> (i32, i32, i32) {
    %c0_i32 = arith.constant 0 : i32
    %c0_i32_0 = arith.constant 0 : i32
    return %arg0, %c0_i32, %arg1 : i32, i32, i32
  }
  func.func @transform_3(%arg0: i32, %arg1: i32) -> (i32, i32, i32) {
    %c0_i32 = arith.constant 0 : i32
    %c0_i32_0 = arith.constant 0 : i32
    return %arg0, %c0_i32, %arg1 : i32, i32, i32
  }
}

</mosaic_0001>

<bundles_post_ra>
// kernel: mul.5
= control target key start
LH: loop header
LB: loop body
LE: loop exit
PB: predicated region body
PF: predicated region fallthrough
CT: control target
= control target key end

     0   :  { %s40_s8 = smov 104   ;;  %vm8_vm0 = vcmask 64512   ;;  %s41_s9 = smov 112   ;;  %s58_s0 = inlined_call_operand.vmem [shape: f32[32], index: 0, kind: input, shape index: {}]   ;;  %s59_s1 = inlined_call_operand.vmem [shape: f32[4,8], index: 1, kind: output, shape index: {}]  }
   0x1   :  { %v5_v0 = vld [vmem:[%s58_s0] sm:$0x1]  ;;  %s39_s0 = smov 120  }
   0x2   :  { %6 = vst [vmem:[#allocation1] sm:$0x1] %v5_v0 }
   0x9   :  { %v10_v1 = vld [vmem:[#allocation1] sm:$0x1]  }
   0xa   :  { %v22_v2 = vld [vmem:[#allocation1] sm:$0x1]   ;;  %11 = vrot.lane.b32.xlu0 %v10_v1, %s39_s0 }
   0xb   :  { %23 = vrot.lane.b32.xlu1 %v22_v2, %s40_s8  ;;  %v7_v3 = vld [vmem:[#allocation1] sm:$0x1]  }
   0xc   :  { %v16_v4 = vld [vmem:[#allocation1] sm:$0x1]   ;;  %9 = vst.msk [vmem:[#allocation0] sm:$0x1] %vm8_vm0, %v7_v3  }
   0xe   :  { %17 = vrot.lane.b32.xlu0 %v16_v4, %s41_s9 }
  0x7c   :  { %v12_v5 = vpop.permute.xlu0 %11  }
  0x7d   :  { %v24_v6 = vpop.permute.xlu1 %23   ;;  %15 = vst.msk [vmem:[#allocation0 + $0x1] sm:$0x1] %vm8_vm0, %v12_v5  }
  0x7e   :  { %27 = vst.msk [vmem:[#allocation0 + $0x3] sm:$0x1] %vm8_vm0, %v24_v6  }
  0x80   :  { %v18_v7 = vpop.permute.xlu0 %17  }
  0x81   :  { %21 = vst.msk [vmem:[#allocation0 + $0x2] sm:$0x1] %vm8_vm0, %v18_v7  }
  0x88   :  { %v32_v8 = vld [vmem:[#allocation0] sm:$0xf] }
  0x89   :  { %35 = vst [vmem:[%s59_s1] sm:$0xf] %v32_v8 }

// kernel: sub.2
= control target key start
LH: loop header
LB: loop body
LE: loop exit
PB: predicated region body
PF: predicated region fallthrough
CT: control target
= control target key end

     0   :  { %s34_s0 = inlined_call_operand.vmem [shape: f32[32,1], index: 0, kind: input, shape index: {}]   ;;  %s35_s1 = inlined_call_operand.vmem [shape: f32[32,1], index: 1, kind: input, shape index: {}]   ;;  %s36_s2 = inlined_call_operand.vmem [shape: f32[32,1], index: 2, kind: output, shape index: {}]  }
   0x1   :  { %v3_v0 = vld [vmem:[%s34_s0] sm:$0x1] }
   0x2   :  { %v4_v1 = vld [vmem:[%s35_s1] sm:$0x1] }
   0x3   :  { %v7_v2 = vsub.f32 %v3_v0, %v4_v1 }
   0x5   :  { %9 = vst [vmem:[%s36_s2] sm:$0x1] %v7_v2 }

// kernel: zca_norm_pi_eval.1
= control target key start
LH: loop header
LB: loop body
LE: loop exit
PB: predicated region body
PF: predicated region fallthrough
CT: control target
= control target key end

     0   :  { %s542_s12 = smov 0   ;;  %s544_s13 = smov 0   ;;  %s610_s0 = inlined_call_operand.vmem [shape: f32[32,32], index: 0, kind: input, shape index: {}]   ;;  %s611_s1 = inlined_call_operand.vmem [shape: f32[32,1], index: 1, kind: input, shape index: {}]   ;;  %s612_s2 = inlined_call_operand.vmem [shape: f32[2,32,256], index: 2, kind: input, shape index: {}]   ;;  %s613_s3 = inlined_call_operand.vmem [shape: f32[2,32,256], index: 3, kind: output, shape index: {}]  }
   0x1   :  { %s546_s14 = smov 0  }
   0x2 LB: > { %s25_s15 = sadd.s32 1, %s514_s13  ;;  %p447_p0 = scmp.ge.s32.totalorder %s518_s14, 1  ;;  %s518_s14 = sphi %s546_s14, %s13_s14   ;;  %s514_s13 = sphi %s544_s13, %s615_s13   ;;  %s510_s12 = sphi %s542_s12, %s614_s12  }
   0x3   : > { %p27_p1 = scmp.ge.s32.totalorder %s25_s15, 2  ;;  %p158_p2 = scmp.lt.s32.totalorder %s518_s14, 3 }
   0x5   : > { %s617_s15 = smov (%p27_p1, %s25_s15), 0  ;;  %p159_p3 = pnand %p447_p0, %p158_p2 }
   0x6   : > { %p191_p4 = scmp.lt.s32.totalorder (!%p159_p3), %s510_s12, 1 }
   0x7   : > { %162 = sbr.rel (%p159_p3) target bundleno = 226 (0xe2), region = 32 }
   0xc   : > { %v520_v0 = vmov 0.0   ;;  %v224_v1 = vld [vmem:[%s611_s1 + $0x10] sm:$0xff]  ;;  %v222_v2 = vld [vmem:[%s611_s1] sm:$0xff]  ;;  %s619_s12 = smov (!%p191_p4, %s510_s12), 1  ;;  %v521_v3 = vmov 0   ;;  %vm246_vm0 = vcmask 261120  }
   0xd   : > { %323 = vmatprep.mubr.f32.mxu0 %v520_v0  ;;  %335 = vmatprep.mubr.f32.mxu1 %v520_v0  ;;  %s458_s20 = sshll.u32 %s619_s12, 6  ;;  %v218_v12 = vld [vmem:[%s610_s0] sm:$0xff]  ;;  %v220_v13 = vld [vmem:[%s610_s0 + $0x10] sm:$0xff]  ;;  %v225_v14 = vld [vmem:[%s611_s1 + $0x18] sm:$0xff] }
   0xe   : > { %495 = vset.pattern.permute.xlu1 %v521_v3  ;;  %494 = vset.pattern.permute.xlu0 %v521_v3  ;;  %s198_s23 = scalar_lea.vmem %s612_s2, %s458_s20  ;;  %v223_v15 = vld [vmem:[%s611_s1 + $0x8] sm:$0xff]  ;;  %v221_v17 = vld [vmem:[%s610_s0 + $0x18] sm:$0xff]  ;;  %s208_s11 = scalar_lea.vmem %s613_s3, %s458_s20 }
   0xf   : > { %238 = vperm.xlu1 %495, %v224_v1   ;;  %228 = vperm.xlu0 %494, %v222_v2   ;;  %v217_v4 = vld [vmem:[%s198_s23 + $0x38] sm:$0xff]  ;;  %v216_v5 = vld [vmem:[%s198_s23 + $0x30] sm:$0xff]  ;;  %v215_v6 = vld [vmem:[%s198_s23 + $0x28] sm:$0xff] }
  0x10   : > { %283 = vmatprep.subr.mxu0 %v217_v4  ;;  %460 = vmatprep.subr.mxu1 %v217_v4  ;;  %v214_v7 = vld [vmem:[%s198_s23 + $0x20] sm:$0xff]  ;;  %v213_v8 = vld [vmem:[%s198_s23 + $0x18] sm:$0xff]  ;;  %v212_v9 = vld [vmem:[%s198_s23 + $0x10] sm:$0xff] }
  0x11   : > { %284 = vmatpush1.msra.mxu0 %v216_v5  ;;  %464 = vmatpush1.msra.mxu1 %v216_v5  ;;  %v211_v10 = vld [vmem:[%s198_s23 + $0x8] sm:$0xff]  ;;  %v210_v11 = vld [vmem:[%s198_s23] sm:$0xff] }
  0x12   : > { %285 = vmatprep.subr.mxu0 %v215_v6  ;;  %461 = vmatprep.subr.mxu1 %v215_v6  ;;  %v219_v16 = vld [vmem:[%s610_s0 + $0x8] sm:$0xff] }
  0x13   : > { %286 = vmatpush1.msra.mxu0 %v214_v7  ;;  %465 = vmatpush1.msra.mxu1 %v214_v7 }
  0x14   : > { %287 = vmatprep.subr.mxu0 %v213_v8  ;;  %462 = vmatprep.subr.mxu1 %v213_v8 }
  0x15   : > { %288 = vmatpush1.msra.mxu0 %v212_v9  ;;  %466 = vmatpush1.msra.mxu1 %v212_v9 }
  0x16   : > { %289 = vmatprep.subr.mxu0 %v211_v10  ;;  %463 = vmatprep.subr.mxu1 %v211_v10 }
  0x17   : > { %290 = vmatpush1.msra.mxu0 %v210_v11  ;;  %467 = vmatpush1.msra.mxu1 %v210_v11 }
  0x18   : > { %452 = vmatmul.mubr.msk.f32.vlgmr.msra.gmra.mxu0 %vm246_vm0, %v218_v12  ;;  %454 = vmatmul.mubr.msk.f32.vlgmr.msra.gmra.mxu1 %vm246_vm0, %v220_v13 }
  0x19   : > { %329 = vmatprep.mubr.f32.mxu0 %v520_v0  ;;  %341 = vmatprep.mubr.f32.mxu1 %v520_v0 }
  0x1a   : > { %243 = vperm.xlu1 %495, %v225_v14   ;;  %233 = vperm.xlu0 %494, %v223_v15  }
  0x1c   : > { %453 = vmatmul.mubr.msk.f32.gmra.mxu0 %vm246_vm0, %v219_v16  ;;  %455 = vmatmul.mubr.msk.f32.gmra.mxu1 %vm246_vm0, %v221_v17 }
  0x8a   : > { %v239_v18 = vpop.permute.xlu1 %238  ;;  %v229_v19 = vpop.permute.xlu0 %228 }
  0x95   : > { %v244_v26 = vpop.permute.xlu1 %243  ;;  %v234_v27 = vpop.permute.xlu0 %233 }
  0xd8   : > { %v325_v20 = vpop.f32.mrf.mxu0  ;;  %v337_v21 = vpop.f32.mrf.mxu1 }
  0xd9   : > { %v326_v22 = vadd.f32 %v325_v20, %v229_v19  ;;  %v338_v23 = vadd.f32 %v337_v21, %v239_v18 }
  0xda   : > { %v327_v24 = vpop.f32.mrf.mxu0  ;;  %v339_v25 = vpop.f32.mrf.mxu1 }
  0xdb   : > { %348 = vst [vmem:[%s208_s11] sm:$0xff] %v326_v22  ;;  %352 = vst [vmem:[%s208_s11 + $0x20] sm:$0xff] %v338_v23  ;;  %v328_v28 = vadd.f32 %v327_v24, %v229_v19  ;;  %v340_v29 = vadd.f32 %v339_v25, %v239_v18 }
  0xdc   : > { %v331_v30 = vpop.f32.mrf.mxu0  ;;  %v343_v31 = vpop.f32.mrf.mxu1 }
  0xdd   : > { %349 = vst [vmem:[%s208_s11 + $0x8] sm:$0xff] %v328_v28  ;;  %353 = vst [vmem:[%s208_s11 + $0x28] sm:$0xff] %v340_v29  ;;  %v332_v32 = vadd.f32 %v331_v30, %v234_v27  ;;  %v344_v33 = vadd.f32 %v343_v31, %v244_v26 }
  0xde   : > { %v333_v34 = vpop.f32.mrf.mxu0  ;;  %v345_v35 = vpop.f32.mrf.mxu1 }
  0xdf   : > { %350 = vst [vmem:[%s208_s11 + $0x10] sm:$0xff] %v332_v32  ;;  %354 = vst [vmem:[%s208_s11 + $0x30] sm:$0xff] %v344_v33  ;;  %v334_v36 = vadd.f32 %v333_v34, %v234_v27  ;;  %v346_v37 = vadd.f32 %v345_v35, %v244_v26 }
  0xe1   : > { %351 = vst [vmem:[%s208_s11 + $0x18] sm:$0xff] %v334_v36  ;;  %355 = vst [vmem:[%s208_s11 + $0x38] sm:$0xff] %v346_v37 }
  0xe2 PF: > { %s13_s14 = sadd.s32 1, %s518_s14   ;;  %s614_s12 = smov %s514_s13 }
  0xe3   : > { %p10_p5 = scmp.ge.s32.totalorder %s13_s14, 4   ;;  %s615_s13 = smov %s617_s15 }
  0xe5   :  { %12 = sbr.rel (!%p10_p5) target bundleno = 2 (0x2), region = 62 }

</bundles_post_ra>
